<compile_context>
chip_gen: v7x
topology: tpu7x:2x2x1
jax: 0.10.0
libtpu: 0.0.40
codegen_flags: <defaults>
</compile_context>

<pallas_src>
import jax
import jax.numpy as jnp
from jax.experimental import pallas as pl
from jax.experimental.pallas import tpu as pltpu

# ---- config -----------------------------------------------------------------
N_EMBD = 32
HIDDEN = 4 * N_EMBD     # 128
DROPOUT = 0.0           # eval-mode -> identity anyway
TM_MAX = 512            # row tile: >=256 fills the 2x256 MXU on v6e/v7x


def _round_up(x, m):
    return ((x + m - 1) // m) * m


# ---- kernel -----------------------------------------------------------------
def ffn_kernel(x_ref, w1_ref, b1_ref, w2_ref, b2_ref, o_ref):
    # x_ref: (TM, C) bf16; w1: (C, 4C) bf16; b1: (1, 4C) f32;
    # w2: (4C, C) bf16;    b2: (1, C) f32;  o_ref: (TM, C) out dtype
    x = x_ref[...]

    # first linear (bf16 MXU, f32 accumulate) + bias + ReLU
    h = jnp.dot(x, w1_ref[...], preferred_element_type=jnp.float32) + b1_ref[...]
    h = jnp.maximum(h, 0.0)

    # second linear (feed activations back to the MXU as bf16, f32 accumulate)
    y = jnp.dot(h.astype(jnp.bfloat16), w2_ref[...],
                preferred_element_type=jnp.float32) + b2_ref[...]

    # dropout is identity in eval mode
    o_ref[...] = y.astype(o_ref.dtype)


# ---- wrapper ----------------------------------------------------------------
def feedforward_forward(x, w1, b1, w2, b2):
    """x: (B, T, C) f32; w1: (C, 4C); b1: (4C,); w2: (4C, C); b2: (C,)."""
    B, T, C = x.shape
    assert C == N_EMBD
    out_dtype = x.dtype

    rows = B * T
    tm = min(TM_MAX, _round_up(rows, 8))
    rows_pad = _round_up(rows, tm)

    # bf16 I/O (cast once here, outside the kernel); biases stay f32.
    x2d = x.reshape(rows, C).astype(jnp.bfloat16)
    if rows_pad != rows:
        x2d = jnp.pad(x2d, ((0, rows_pad - rows), (0, 0)))
    w1_bf = w1.astype(jnp.bfloat16)
    w2_bf = w2.astype(jnp.bfloat16)
    b1_2d = b1.reshape(1, HIDDEN).astype(jnp.float32)
    b2_2d = b2.reshape(1, C).astype(jnp.float32)

    grid = (rows_pad // tm,)

    out2d = pl.pallas_call(
        ffn_kernel,
        out_shape=jax.ShapeDtypeStruct((rows_pad, C), out_dtype),
        grid=grid,
        in_specs=[
            pl.BlockSpec((tm, C), lambda i: (i, 0)),          # x: tiled over rows
            pl.BlockSpec((C, HIDDEN), lambda i: (0, 0)),      # w1: resident
            pl.BlockSpec((1, HIDDEN), lambda i: (0, 0)),      # b1: resident
            pl.BlockSpec((HIDDEN, C), lambda i: (0, 0)),      # w2: resident
            pl.BlockSpec((1, C), lambda i: (0, 0)),           # b2: resident
        ],
        out_specs=pl.BlockSpec((tm, C), lambda i: (i, 0)),
        compiler_params=pltpu.CompilerParams(
            dimension_semantics=("parallel",),                # 2 TCs on v7x
        ),
    )(x2d, w1_bf, b1_2d, w2_bf, b2_2d)

    return out2d[:rows].reshape(B, T, C)


# ---- plain-JAX references (for sanity check) --------------------------------
def feedforward_reference_f32(x, w1, b1, w2, b2):
    h = jnp.maximum(x @ w1 + b1, 0.0)
    return h @ w2 + b2


def feedforward_reference_bf16(x, w1, b1, w2, b2):
    # Mirrors the kernel's bf16-in / f32-accumulate path.
    xb = x.astype(jnp.bfloat16)
    h = jnp.dot(xb, w1.astype(jnp.bfloat16),
                preferred_element_type=jnp.float32) + b1.astype(jnp.float32)
    h = jnp.maximum(h, 0.0)
    y = jnp.dot(h.astype(jnp.bfloat16), w2.astype(jnp.bfloat16),
                preferred_element_type=jnp.float32) + b2.astype(jnp.float32)
    return y.astype(x.dtype)


# ---- main -------------------------------------------------------------------
if __name__ == "__main__":
    key = jax.random.PRNGKey(0)
    kx, kw1, kb1, kw2, kb2 = jax.random.split(key, 5)

    B, T, C = 2, 8, N_EMBD

    x = jax.random.normal(kx, (B, T, C), dtype=jnp.float32)

    # nn.Linear default init: U(-1/sqrt(fan_in), 1/sqrt(fan_in)); weights
    # stored pre-transposed as (in_features, out_features).
    bound1 = 1.0 / (C ** 0.5)
    w1 = jax.random.uniform(kw1, (C, HIDDEN), jnp.float32, -bound1, bound1)
    b1 = jax.random.uniform(kb1, (HIDDEN,), jnp.float32, -bound1, bound1)

    bound2 = 1.0 / (HIDDEN ** 0.5)
    w2 = jax.random.uniform(kw2, (HIDDEN, C), jnp.float32, -bound2, bound2)
    b2 = jax.random.uniform(kb2, (C,), jnp.float32, -bound2, bound2)

    out = feedforward_forward(x, w1, b1, w2, b2)
    out = jax.block_until_ready(out)
    assert out.shape == (B, T, C)

    # Tight check against a reference using the same bf16 MXU path.
    ref_bf16 = feedforward_reference_bf16(x, w1, b1, w2, b2)
    assert jnp.allclose(out, ref_bf16, atol=5e-3, rtol=5e-3), "mismatch vs bf16 reference"

    # Loose check against the pure-f32 math (bf16 quantization error only).
    ref_f32 = feedforward_reference_f32(x, w1, b1, w2, b2)
    assert jnp.allclose(out, ref_f32, atol=5e-2, rtol=5e-2), "mismatch vs f32 reference"

    print("KERNEL_OK")
</pallas_src>

<mosaic_0001>
module attributes {stable_mosaic.version = 11 : i64} {
  func.func @ffn_kernel(%arg0: i32, %arg1: memref<16x32xbf16, #tpu.memory_space<vmem>>, %arg2: memref<32x128xbf16, #tpu.memory_space<vmem>>, %arg3: memref<1x128xf32, #tpu.memory_space<vmem>>, %arg4: memref<128x32xbf16, #tpu.memory_space<vmem>>, %arg5: memref<1x32xf32, #tpu.memory_space<vmem>>, %arg6: memref<16x32xf32, #tpu.memory_space<vmem>>) attributes {dimension_semantics = [#tpu.dimension_semantics<parallel>], iteration_bounds = array<i64: 1>, scalar_prefetch = 0 : i64, scratch_operands = 0 : i64, tpu.core_type = #tpu.core_type<tc>, window_params = [{transform_indices = @transform_0, window_bounds = array<i64: 16, 32>}, {pipeline_mode = #tpu.pipeline_mode<synchronous>, transform_indices = @transform_1, window_bounds = array<i64: 32, 128>}, {pipeline_mode = #tpu.pipeline_mode<synchronous>, transform_indices = @transform_2, window_bounds = array<i64: 1, 128>}, {pipeline_mode = #tpu.pipeline_mode<synchronous>, transform_indices = @transform_3, window_bounds = array<i64: 128, 32>}, {pipeline_mode = #tpu.pipeline_mode<synchronous>, transform_indices = @transform_4, window_bounds = array<i64: 1, 32>}, {transform_indices = @transform_5, window_bounds = array<i64: 16, 32>}]} {
    %c0 = arith.constant 0 : index
    %c0_0 = arith.constant 0 : index
    %0 = vector.load %arg1[%c0, %c0_0] : memref<16x32xbf16, #tpu.memory_space<vmem>>, vector<16x32xbf16>
    %c0_1 = arith.constant 0 : index
    %c0_2 = arith.constant 0 : index
    %1 = vector.load %arg2[%c0_1, %c0_2] : memref<32x128xbf16, #tpu.memory_space<vmem>>, vector<32x128xbf16>
    %cst = arith.constant dense<0.000000e+00> : vector<16x128xf32>
    %2 = tpu.matmul %0, %1, %cst {dimension_numbers = #tpu.dot_dimension_numbers<[1], [0], [0], [1], [0, 0, 1, 1], [], []>} : vector<16x32xbf16>, vector<32x128xbf16>, vector<16x128xf32> -> vector<16x128xf32>
    %c0_3 = arith.constant 0 : index
    %c0_4 = arith.constant 0 : index
    %3 = vector.load %arg3[%c0_3, %c0_4] : memref<1x128xf32, #tpu.memory_space<vmem>>, vector<1x128xf32>
    %4 = vector.broadcast %3 : vector<1x128xf32> to vector<16x128xf32>
    %5 = arith.addf %2, %4 : vector<16x128xf32>
    %cst_5 = arith.constant 0.000000e+00 : f32
    %6 = vector.broadcast %cst_5 : f32 to vector<16x128xf32>
    %7 = arith.maximumf %5, %6 : vector<16x128xf32>
    %8 = arith.truncf %7 : vector<16x128xf32> to vector<16x128xbf16>
    %c0_6 = arith.constant 0 : index
    %c0_7 = arith.constant 0 : index
    %9 = vector.load %arg4[%c0_6, %c0_7] : memref<128x32xbf16, #tpu.memory_space<vmem>>, vector<128x32xbf16>
    %cst_8 = arith.constant dense<0.000000e+00> : vector<16x32xf32>
    %10 = tpu.matmul %8, %9, %cst_8 {dimension_numbers = #tpu.dot_dimension_numbers<[1], [0], [0], [1], [0, 0, 1, 1], [], []>} : vector<16x128xbf16>, vector<128x32xbf16>, vector<16x32xf32> -> vector<16x32xf32>
    %c0_9 = arith.constant 0 : index
    %c0_10 = arith.constant 0 : index
    %11 = vector.load %arg5[%c0_9, %c0_10] : memref<1x32xf32, #tpu.memory_space<vmem>>, vector<1x32xf32>
    %12 = vector.broadcast %11 : vector<1x32xf32> to vector<16x32xf32>
    %13 = arith.addf %10, %12 : vector<16x32xf32>
    %c0_11 = arith.constant 0 : index
    %c0_12 = arith.constant 0 : index
    %14 = vector.load %arg6[%c0_11, %c0_12] : memref<16x32xf32, #tpu.memory_space<vmem>>, vector<16x32xf32>
    tpu.vector_store %arg6[%c0_11, %c0_12], %13 {strides = array<i32>} : memref<16x32xf32, #tpu.memory_space<vmem>>, vector<16x32xf32>,
    return
  }
  func.func @transform_0(%arg0: i32) -> (i32, i32) {
    %c0_i32 = arith.constant 0 : i32
    %c0_i32_0 = arith.constant 0 : i32
    return %arg0, %c0_i32 : i32, i32
  }
  func.func @transform_1(%arg0: i32) -> (i32, i32) {
    %c0_i32 = arith.constant 0 : i32
    %c0_i32_0 = arith.constant 0 : i32
    %c0_i32_1 = arith.constant 0 : i32
    return %c0_i32, %c0_i32_0 : i32, i32
  }
  func.func @transform_2(%arg0: i32) -> (i32, i32) {
    %c0_i32 = arith.constant 0 : i32
    %c0_i32_0 = arith.constant 0 : i32
    %c0_i32_1 = arith.constant 0 : i32
    return %c0_i32, %c0_i32_0 : i32, i32
  }
  func.func @transform_3(%arg0: i32) -> (i32, i32) {
    %c0_i32 = arith.constant 0 : i32
    %c0_i32_0 = arith.constant 0 : i32
    %c0_i32_1 = arith.constant 0 : i32
    return %c0_i32, %c0_i32_0 : i32, i32
  }
  func.func @transform_4(%arg0: i32) -> (i32, i32) {
    %c0_i32 = arith.constant 0 : i32
    %c0_i32_0 = arith.constant 0 : i32
    %c0_i32_1 = arith.constant 0 : i32
    return %c0_i32, %c0_i32_0 : i32, i32
  }
  func.func @transform_5(%arg0: i32) -> (i32, i32) {
    %c0_i32 = arith.constant 0 : i32
    %c0_i32_0 = arith.constant 0 : i32
    return %arg0, %c0_i32 : i32, i32
  }
}

</mosaic_0001>

<bundles_post_ra>
// kernel: tpu_custom_call.1
= control target key start
LH: loop header
LB: loop body
LE: loop exit
PB: predicated region body
PF: predicated region fallthrough
CT: control target
= control target key end

     0   :  { %v324_v1 = vmov 0.0   ;;  %vm325_vm0 = vmmov 0   ;;  %vm52_vm1 = vcmask 261120   ;;  %s413_s0 = inlined_call_operand.vmem [shape: bf16[16,32], index: 0, kind: input, shape index: {}]   ;;  %s414_s1 = inlined_call_operand.vmem [shape: bf16[32,128], index: 1, kind: input, shape index: {}]   ;;  %s415_s2 = inlined_call_operand.vmem [shape: f32[1,128], index: 2, kind: input, shape index: {}]   ;;  %s416_s3 = inlined_call_operand.vmem [shape: bf16[128,32], index: 3, kind: input, shape index: {}]   ;;  %s417_s4 = inlined_call_operand.vmem [shape: f32[1,32], index: 4, kind: input, shape index: {}]   ;;  %s418_s5 = inlined_call_operand.hbm [shape: f32[16,32], index: 5, kind: output, shape index: {}]  }
   0x1   :  { %v289_v0 = vld [vmem:[%s414_s1] sm:$0xff]   ;;  %256 = vmatprep.subr.bf16.mxu0 %v324_v1  ;;  %264 = vmatprep.subr.bf16.mxu1 %v324_v1  ;;  %v290_v2 = vld [vmem:[%s414_s1 + $0x8] sm:$0xff]   ;;  %v294_v6 = vld [vmem:[%s416_s3 + $0x10] sm:$0xff]  }
   0x2   :  { %257 = vmatpush3.bf16.msra.mxu0 %v289_v0  ;;  %260 = vmatprep.mubr.msk.bf16.mxu0 %vm325_vm0, %v324_v1  ;;  %v292_v3 = vld [vmem:[%s416_s3] sm:$0xff]   ;;  %v293_v5 = vld [vmem:[%s416_s3 + $0x8] sm:$0xff]  }
   0x3   :  { %258 = vmatprep.subr.bf16.mxu0 %v324_v1  ;;  %280 = vmatprep.mubr.msk.bf16.mxu1 %vm325_vm0, %v324_v1  ;;  %v291_v4 = vld [vmem:[%s413_s0] sm:$0xff]  }
   0x4   :  { %265 = vmatpush3.bf16.msra.mxu1 %v292_v3 }
   0x5   :  { %266 = vmatprep.subr.bf16.mxu1 %v324_v1 }
   0x6   :  { %259 = vmatpush3.bf16.msra.mxu0 %v290_v2 }
   0x8   :  { %267 = vmatpush3.bf16.msra.mxu1 %v293_v5 }
   0x9   :  { %261 = vmatmul.mubr.msk.bf16.vlgmr.msra.gmra.mrb[0].mxu0 %vm52_vm1, %v291_v4  ;;  %268 = vmatprep.subr.bf16.mxu1 %v324_v1 }
   0xa   :  { %10 = vsyncpa [#allocation3], 0  ;;  %v295_v7 = vld [vmem:[%s416_s3 + $0x18] sm:$0xff]   ;;  %v296_v8 = vld [vmem:[%s416_s3 + $0x20] sm:$0xff]  }
   0xb   :  { %v297_v9 = vld [vmem:[%s416_s3 + $0x28] sm:$0xff]   ;;  %v298_v10 = vld [vmem:[%s416_s3 + $0x30] sm:$0xff]   ;;  %v299_v11 = vld [vmem:[%s416_s3 + $0x38] sm:$0xff]   ;;  %s326_s3 = smov [#allocation2]  }
   0xc   :  { %269 = vmatpush3.bf16.msra.mxu1 %v294_v6  ;;  %v230_v12 = vld [vmem:[%s415_s2] ss:$0 sm:$0xff]  ;;  %s219_s17 = sshll.u32 %s326_s3, 4  ;;  %s220_s17 = int_to_ptr.vmem [resolvable:$true] %s219_s17 }
   0xd   :  { %270 = vmatprep.subr.bf16.mxu1 %v324_v1  ;;  %v235_v22 = vld [vmem:[%s417_s4] ss:$0 sm:$0xff]  ;;  %s300_s2 = scalar_lea.vmem %s220_s17, 256  ;;  %p305_p1 = scmp.lt.s32.totalorder %s220_s17, %s220_s17 }
   0xe   :  { %p301_p0 = scmp.ne.s32.totalorder %s220_s17, %s300_s2  ;;  %p306_p2 = scmp.lt.s32.totalorder %s300_s2, %s300_s2 }
  0x10   :  { %271 = vmatpush3.bf16.msra.mxu1 %v295_v7  ;;  %p307_p3 = por %p306_p2, %p305_p1 }
  0x11   :  { %272 = vmatprep.subr.bf16.mxu1 %v324_v1 }
  0x12   :  { %p308_p4 = pnand %p307_p3, %p301_p0 }
  0x14   :  { %273 = vmatpush3.bf16.msra.mxu1 %v296_v8 }
  0x15   :  { %274 = vmatprep.subr.bf16.mxu1 %v324_v1 }
  0x18   :  { %275 = vmatpush3.bf16.msra.mxu1 %v297_v9 }
  0x19   :  { %276 = vmatprep.subr.bf16.mxu1 %v324_v1 }
  0x1c   :  { %277 = vmatpush3.bf16.msra.mxu1 %v298_v10 }
  0x1d   :  { %278 = vmatprep.subr.bf16.mxu1 %v324_v1 }
  0x20   :  { %279 = vmatpush3.bf16.msra.mxu1 %v299_v11 }
  0xdc   :  { %v90_v13 = vpop.f32.mrb[0].mxu0 }
  0xdd   :  { %v91_v14 = vadd.f32 %v230_v12, %v90_v13  ;;  %v262_v15 = vpop.f32.mrb[1].mxu0 }
  0xde   :  { %v93_v16 = vpop.f32.mrb[2].mxu0 }
  0xdf   :  { %v94_v17 = vadd.f32 %v230_v12, %v93_v16  ;;  %v263_v18 = vpop.f32.mrb[3].mxu0  ;;  %v97_v19 = vmax.f32 %v91_v14, 0.0 }
  0xe1   :  { %v98_v20 = vmax.f32 %v94_v17, 0.0 }
  0xe3   :  { %v99_v21 = vpack.c.bf16 %v98_v20, %v97_v19 }
  0xe5   :  { %281 = vmatmul.mubr.bf16.vlgmr.msra.gmra.mrb[0].mxu1 %v99_v21 }
 0x1b8   :  { %v205_v23 = vpop.f32.mrb[0].mxu1 }
 0x1b9   :  { %v206_v24 = vadd.f32 %v235_v22, %v205_v23  ;;  %v282_v25 = vpop.f32.mrb[1].mxu1 }
 0x1ba   :  { %v208_v26 = vpop.f32.mrb[2].mxu1 }
 0x1bb   :  { %212 = vst.msk [vmem:[#allocation2] sm:$0xff] %vm52_vm1, %v206_v24  ;;  %v209_v27 = vadd.f32 %v235_v22, %v208_v26  ;;  %v283_v28 = vpop.f32.mrb[3].mxu1 }
 0x1bd   :  { %213 = vst.msk [vmem:[#allocation2 + $0x8] sm:$0xff] %vm52_vm1, %v209_v27 }
 0x1be   :  { %311 = shalt.err (!%p308_p4)
}
 0x1bf   :  { %s312_s19 = scalar_lea.hbm %s418_s5, 256 }
 0x1c0   :  { %p313_p5 = scmp.ne.s32.totalorder %s418_s5, %s312_s19  ;;  %p316_p6 = scmp.lt.u32.totalorder %s312_s19, %s418_s5 }
 0x1c2   :  { %p318_p7 = pnand %p316_p6, %p313_p5 }
 0x1c4   :  { %321 = shalt.err (!%p318_p7)
}
 0x1c5   :  { %s327_s24 = smov 128   ;;  %s328_s25 = smov 8  }
 0x1c6   :  { %225 = dma.vmem_to_hbm [thread:$0]  %s220_s17, 256, %s418_s5, [#allocation3], %s327_s24, %s327_s24, %s328_s25  }
 0x1c7   :  { %322 = dma.done.wait [#allocation3], 256  }
 0x1c8   :  { %323 = vsyncadd [#allocation3], 4294967040 }
 0x1c9   :  { %229 = vsyncpa [#allocation3], 1 }

</bundles_post_ra>
